<compile_context>
chip_gen: v5e
topology: v5e:2x2
jax: 0.10.0
libtpu: 0.0.40
codegen_flags: <defaults>
</compile_context>

<pallas_src>
import functools

import jax
import jax.numpy as jnp
from jax.experimental import pallas as pl
from jax.experimental.pallas import tpu as pltpu


def _round_up(n: int, m: int) -> int:
    return ((n + m - 1) // m) * m


def _fused_mlp_kernel(*refs, num_layers: int):
    # refs = (x_ref, w0_ref, b0_ref, w1_ref, b1_ref, ..., o_ref)
    x_ref = refs[0]
    o_ref = refs[-1]
    param_refs = refs[1:-1]

    h = x_ref[...].astype(jnp.float32)
    for l in range(num_layers):                     # unrolled at trace time
        w_ref = param_refs[2 * l]                   # [Din(_pad), Dout_pad]  bf16
        b_ref = param_refs[2 * l + 1]               # [1, Dout_pad]          f32
        # bf16 x bf16 on the MXU, accumulate in f32
        h = jnp.dot(h.astype(jnp.bfloat16), w_ref[...],
                    preferred_element_type=jnp.float32)
        h = h + b_ref[...]                          # broadcast over batch rows (f32)
        if l < num_layers - 1:                      # ReLU after every hidden layer
            h = jnp.maximum(h, 0.0)
    o_ref[...] = h.astype(o_ref.dtype)


class MLPPredictorPallas:
    """JAX/Pallas re-implementation of the PyTorch MLPPredictor forward pass."""

    def __init__(self, input_size, hidden_size, output_size, key, batch_tile=256):
        if isinstance(hidden_size, int):
            hidden_size = [hidden_size]
        dims = [input_size] + list(hidden_size) + [output_size]
        self.input_size = int(input_size)
        self.output_size = int(output_size)
        # bf16 operands -> keep batch tiling 16-aligned (sublane pack of 16)
        self.batch_tile = max(16, _round_up(int(batch_tile), 16))

        self.params = []          # unpadded f32 (w_t [Din, Dout], b [Dout]) reference
        self.padded_params = []   # (w_pad bf16 [Din(_p), Dout_p], b_pad f32 [1, Dout_p])
        for i in range(len(dims) - 1):
            din, dout = dims[i], dims[i + 1]
            key, kw, kb = jax.random.split(key, 3)
            bound = 1.0 / (din ** 0.5)          # nn.Linear default init U(-1/sqrt(din), .)
            w = jax.random.uniform(kw, (dout, din), jnp.float32, -bound, bound)
            b = jax.random.uniform(kb, (dout,), jnp.float32, -bound, bound)
            w_t = w.T                            # [din, dout] so kernel does y = x @ W + b
            self.params.append((w_t, b))

            # Layer 0 keeps its true (unpadded) input dim so x needs no lane padding;
            # later layers' input dim equals the previous layer's padded output dim.
            din_p = din if i == 0 else _round_up(din, 128)
            dout_p = _round_up(dout, 128)
            # zero padding is load-bearing: padded lanes stay exactly 0 through
            # bias-add (bias pad = 0) and ReLU, and the padded input rows of the next
            # layer's weight are 0, so nothing leaks into real lanes.
            w_pad = (jnp.zeros((din_p, dout_p), jnp.float32)
                     .at[:din, :dout].set(w_t).astype(jnp.bfloat16))
            b_pad = jnp.zeros((1, dout_p), jnp.float32).at[0, :dout].set(b)
            self.padded_params.append((w_pad, b_pad))

        self._param_bytes = int(sum(w.size * w.dtype.itemsize + b.size * b.dtype.itemsize
                                    for w, b in self.padded_params))
        self._max_width = max(w.shape[1] for w, _ in self.padded_params)
        self._flops_per_row = int(2 * sum(w.shape[0] * w.shape[1]
                                          for w, _ in self.padded_params))

    # ---------------------------------------------------------------- helpers
    @staticmethod
    def _vmem_limit(resident_bytes):
        headroom = 2 * 1024 * 1024
        need = int(resident_bytes) + headroom
        # floor at 32 MiB (harmless), cap at 64 MiB (v7x physical VMEM)
        return int(min(64 * 1024 * 1024, max(need, 32 * 1024 * 1024)))

    def _cost(self, B_pad, Din, Dout_pad):
        return pl.CostEstimate(
            flops=int(B_pad * self._flops_per_row),
            transcendentals=0,
            bytes_accessed=int(B_pad * Din * 4 + B_pad * Dout_pad * 4
                               + self._param_bytes),
        )

    def _grid_call(self, kernel, x_in, flat_params, tb, B_pad, Din, Dout_pad,
                   num_layers, resident, single_buffer_weights):
        const_kwargs = (dict(pipeline_mode=pl.Buffered(1))
                        if single_buffer_weights else {})
        in_specs = [pl.BlockSpec((tb, Din), lambda i: (i, 0))]
        for w_pad, b_pad in self.padded_params:
            # constant index_map -> weights stay resident in VMEM across grid steps
            in_specs.append(pl.BlockSpec(w_pad.shape, lambda i: (0, 0), **const_kwargs))
            in_specs.append(pl.BlockSpec(b_pad.shape, lambda i: (0, 0), **const_kwargs))
        return pl.pallas_call(
            kernel,
            out_shape=jax.ShapeDtypeStruct((B_pad, Dout_pad), x_in.dtype),
            grid=(B_pad // tb,),
            in_specs=in_specs,
            out_specs=pl.BlockSpec((tb, Dout_pad), lambda i: (i, 0)),
            compiler_params=pltpu.CompilerParams(
                dimension_semantics=("parallel",),
                vmem_limit_bytes=self._vmem_limit(resident)),
            cost_estimate=self._cost(B_pad, Din, Dout_pad),
        )(x_in, *flat_params)

    # ---------------------------------------------------------------- forward
    def __call__(self, x):
        B, Din = x.shape
        assert Din == self.input_size
        num_layers = len(self.padded_params)
        Dout_pad = self.padded_params[-1][0].shape[1]

        flat_params = []
        for w_pad, b_pad in self.padded_params:
            flat_params += [w_pad, b_pad]
        kernel = functools.partial(_fused_mlp_kernel, num_layers=num_layers)

        if B <= self.batch_tile:
            # ---- small batch: no grid, full-array VMEM blocks (zero grid overhead) ----
            B_pad = _round_up(max(B, 1), 16)
            x_in = x if B_pad == B else jnp.zeros((B_pad, Din), x.dtype).at[:B].set(x)
            resident = (B_pad * Din * 4 + B_pad * Dout_pad * 4
                        + self._param_bytes + 2 * B_pad * self._max_width * 4)
            vmem_spec = pl.BlockSpec(memory_space=pltpu.MemorySpace.VMEM)
            out = pl.pallas_call(
                kernel,
                out_shape=jax.ShapeDtypeStruct((B_pad, Dout_pad), x.dtype),
                in_specs=[vmem_spec] * (1 + 2 * num_layers),
                out_specs=vmem_spec,
                compiler_params=pltpu.CompilerParams(
                    vmem_limit_bytes=self._vmem_limit(resident)),
                cost_estimate=self._cost(B_pad, Din, Dout_pad),
            )(x_in, *flat_params)
        else:
            # ---- large batch: batch-tiled grid, weights resident, batch axis parallel ----
            tb = self.batch_tile
            # keep >= 4 grid steps when the batch allows it (v7x: 2 TCs x >=2 steps each)
            if B >= 4 * 16:
                tb = min(tb, _round_up(-(-B // 4), 16))
            tb = max(tb, 16)
            B_pad = _round_up(B, tb)
            x_in = x if B_pad == B else jnp.zeros((B_pad, Din), x.dtype).at[:B].set(x)
            resident = (2 * tb * Din * 4 + 2 * tb * Dout_pad * 4
                        + self._param_bytes + 2 * tb * self._max_width * 4)
            try:
                out = self._grid_call(kernel, x_in, flat_params, tb, B_pad, Din,
                                      Dout_pad, num_layers, resident,
                                      single_buffer_weights=True)
            except Exception:
                # fallback if this jax build rejects pl.Buffered(1) on input specs
                out = self._grid_call(kernel, x_in, flat_params, tb, B_pad, Din,
                                      Dout_pad, num_layers, resident,
                                      single_buffer_weights=False)

        # slice away batch padding / feature-lane padding only if present
        if B_pad != B or Dout_pad != self.output_size:
            out = out[:B, : self.output_size]
        return out

    def reference(self, x):
        # pure-JAX f32 reference (unpadded params) for correctness check
        n = len(self.params)
        for i, (w_t, b) in enumerate(self.params):
            x = x @ w_t + b
            if i < n - 1:
                x = jnp.maximum(x, 0.0)
        return x


if __name__ == "__main__":
    key = jax.random.PRNGKey(0)
    key, kx, kp, kx2, kp2 = jax.random.split(key, 5)

    batch = 8
    input_size = 32
    hidden_size = [64, 48]
    output_size = 16

    # --- small batch: fused no-grid path ---
    model = MLPPredictorPallas(input_size, hidden_size, output_size, kp)
    x = jax.random.normal(kx, (batch, input_size), jnp.float32)
    out = jax.block_until_ready(model(x))
    ref = model.reference(x)
    assert out.shape == (batch, output_size)
    # bf16 matmuls with f32 accumulation -> bf16-appropriate tolerance
    assert jnp.allclose(out, ref, atol=3e-2, rtol=3e-2), \
        float(jnp.max(jnp.abs(out - ref)))

    # --- larger batch: batch-tiled "parallel" grid path (tiny tile for the test) ---
    model2 = MLPPredictorPallas(input_size, hidden_size, output_size, kp2, batch_tile=16)
    x2 = jax.random.normal(kx2, (24, input_size), jnp.float32)
    out2 = jax.block_until_ready(model2(x2))
    ref2 = model2.reference(x2)
    assert out2.shape == (24, output_size)
    assert jnp.allclose(out2, ref2, atol=3e-2, rtol=3e-2), \
        float(jnp.max(jnp.abs(out2 - ref2)))

    print("KERNEL_OK")
</pallas_src>

<mosaic_0001>
module attributes {stable_mosaic.version = 11 : i64} {
  func.func @_fused_mlp_kernel(%arg0: memref<16x32xf32, #tpu.memory_space<vmem>>, %arg1: memref<32x128xbf16, #tpu.memory_space<vmem>>, %arg2: memref<1x128xf32, #tpu.memory_space<vmem>>, %arg3: memref<128x128xbf16, #tpu.memory_space<vmem>>, %arg4: memref<1x128xf32, #tpu.memory_space<vmem>>, %arg5: memref<128x128xbf16, #tpu.memory_space<vmem>>, %arg6: memref<1x128xf32, #tpu.memory_space<vmem>>, %arg7: memref<16x128xf32, #tpu.memory_space<vmem>>) attributes {dimension_semantics = [], scalar_prefetch = 0 : i64, scratch_operands = 0 : i64, tpu.core_type = #tpu.core_type<tc>} {
    %c0 = arith.constant 0 : index
    %c0_0 = arith.constant 0 : index
    %0 = vector.load %arg0[%c0, %c0_0] : memref<16x32xf32, #tpu.memory_space<vmem>>, vector<16x32xf32>
    %1 = arith.truncf %0 : vector<16x32xf32> to vector<16x32xbf16>
    %c0_1 = arith.constant 0 : index
    %c0_2 = arith.constant 0 : index
    %2 = vector.load %arg1[%c0_1, %c0_2] : memref<32x128xbf16, #tpu.memory_space<vmem>>, vector<32x128xbf16>
    %cst = arith.constant dense<0.000000e+00> : vector<16x128xf32>
    %3 = tpu.matmul %1, %2, %cst {dimension_numbers = #tpu.dot_dimension_numbers<[1], [0], [0], [1], [0, 0, 1, 1], [], []>} : vector<16x32xbf16>, vector<32x128xbf16>, vector<16x128xf32> -> vector<16x128xf32>
    %c0_3 = arith.constant 0 : index
    %c0_4 = arith.constant 0 : index
    %4 = vector.load %arg2[%c0_3, %c0_4] : memref<1x128xf32, #tpu.memory_space<vmem>>, vector<1x128xf32>
    %5 = vector.broadcast %4 : vector<1x128xf32> to vector<16x128xf32>
    %6 = arith.addf %3, %5 : vector<16x128xf32>
    %cst_5 = arith.constant 0.000000e+00 : f32
    %7 = vector.broadcast %cst_5 : f32 to vector<16x128xf32>
    %8 = arith.maximumf %6, %7 : vector<16x128xf32>
    %9 = arith.truncf %8 : vector<16x128xf32> to vector<16x128xbf16>
    %c0_6 = arith.constant 0 : index
    %c0_7 = arith.constant 0 : index
    %10 = vector.load %arg3[%c0_6, %c0_7] : memref<128x128xbf16, #tpu.memory_space<vmem>>, vector<128x128xbf16>
    %cst_8 = arith.constant dense<0.000000e+00> : vector<16x128xf32>
    %11 = tpu.matmul %9, %10, %cst_8 {dimension_numbers = #tpu.dot_dimension_numbers<[1], [0], [0], [1], [0, 0, 1, 1], [], []>} : vector<16x128xbf16>, vector<128x128xbf16>, vector<16x128xf32> -> vector<16x128xf32>
    %c0_9 = arith.constant 0 : index
    %c0_10 = arith.constant 0 : index
    %12 = vector.load %arg4[%c0_9, %c0_10] : memref<1x128xf32, #tpu.memory_space<vmem>>, vector<1x128xf32>
    %13 = vector.broadcast %12 : vector<1x128xf32> to vector<16x128xf32>
    %14 = arith.addf %11, %13 : vector<16x128xf32>
    %cst_11 = arith.constant 0.000000e+00 : f32
    %15 = vector.broadcast %cst_11 : f32 to vector<16x128xf32>
    %16 = arith.maximumf %14, %15 : vector<16x128xf32>
    %17 = arith.truncf %16 : vector<16x128xf32> to vector<16x128xbf16>
    %c0_12 = arith.constant 0 : index
    %c0_13 = arith.constant 0 : index
    %18 = vector.load %arg5[%c0_12, %c0_13] : memref<128x128xbf16, #tpu.memory_space<vmem>>, vector<128x128xbf16>
    %cst_14 = arith.constant dense<0.000000e+00> : vector<16x128xf32>
    %19 = tpu.matmul %17, %18, %cst_14 {dimension_numbers = #tpu.dot_dimension_numbers<[1], [0], [0], [1], [0, 0, 1, 1], [], []>} : vector<16x128xbf16>, vector<128x128xbf16>, vector<16x128xf32> -> vector<16x128xf32>
    %c0_15 = arith.constant 0 : index
    %c0_16 = arith.constant 0 : index
    %20 = vector.load %arg6[%c0_15, %c0_16] : memref<1x128xf32, #tpu.memory_space<vmem>>, vector<1x128xf32>
    %21 = vector.broadcast %20 : vector<1x128xf32> to vector<16x128xf32>
    %22 = arith.addf %19, %21 : vector<16x128xf32>
    %c0_17 = arith.constant 0 : index
    %c0_18 = arith.constant 0 : index
    %23 = vector.load %arg7[%c0_17, %c0_18] : memref<16x128xf32, #tpu.memory_space<vmem>>, vector<16x128xf32>
    tpu.vector_store %arg7[%c0_17, %c0_18], %22 {strides = array<i32>} : memref<16x128xf32, #tpu.memory_space<vmem>>, vector<16x128xf32>,
    return
  }
}

</mosaic_0001>

<bundles_post_ra>
// kernel: tpu_custom_call.1
= control target key start
LH: loop header
LB: loop body
LE: loop exit
PB: predicated region body
PF: predicated region fallthrough
CT: control target
= control target key end

     0   :  { %12 = vsyncpa [#allocation3], 0  ;;  %s635_s0 = inlined_call_operand.hbm [shape: f32[16,32], index: 0, kind: input, shape index: {}]   ;;  %s636_s1 = inlined_call_operand.hbm [shape: bf16[32,128], index: 1, kind: input, shape index: {}]   ;;  %s637_s2 = inlined_call_operand.vmem [shape: f32[1,128], index: 2, kind: input, shape index: {}]   ;;  %s638_s3 = inlined_call_operand.hbm [shape: bf16[128,128], index: 3, kind: input, shape index: {}]   ;;  %s639_s4 = inlined_call_operand.vmem [shape: f32[1,128], index: 4, kind: input, shape index: {}]   ;;  %s640_s5 = inlined_call_operand.hbm [shape: bf16[128,128], index: 5, kind: input, shape index: {}]   ;;  %s641_s6 = inlined_call_operand.vmem [shape: f32[1,128], index: 6, kind: input, shape index: {}]   ;;  %s642_s7 = inlined_call_operand.hbm [shape: f32[16,128], index: 7, kind: output, shape index: {}]  }
   0x1   :  { %13 = vsyncpa [#allocation6], 0 }
   0x2   :  { %14 = vsyncpa [#allocation9], 0  ;;  %s33_s26 = sshll.u32 %s636_s1, 4  ;;  %s34_s26 = int_to_ptr.hbm [resolvable:$true] %s33_s26 }
   0x3   :  { %15 = vsyncpa [#allocation4], 0  ;;  %s556_s27 = smov [#allocation5]   ;;  %s20_s8 = sshll.u32 %s635_s0, 4  ;;  %s21_s8 = int_to_ptr.hbm [resolvable:$true] %s20_s8 }
   0x4   :  { %s35_s28 = sshll.u32 %s556_s27, 4  ;;  %s557_s9 = smov 64   ;;  %s36_s28 = int_to_ptr.vmem [resolvable:$true] %s35_s28 }
   0x5   :  { %s558_s10 = smov 4   ;;  %s559_s11 = smov [#allocation2]  }
   0x6   :  { %41 = dma.hbm_to_vmem [thread:$0]  %s34_s26, 256, %s36_s28, [#allocation6], %s557_s9, %s557_s9, %s558_s10  }
   0x7   :  { %s22_s12 = sshll.u32 %s559_s11, 4  ;;  %s560_s13 = smov 128   ;;  %s23_s12 = int_to_ptr.vmem [resolvable:$true] %s22_s12 }
   0x8   :  { %s561_s14 = smov 8   ;;  %s48_s16 = sshll.u32 %s638_s3, 4  ;;  %s49_s16 = int_to_ptr.hbm [resolvable:$true] %s48_s16 }
   0x9   :  { %28 = dma.hbm_to_vmem [thread:$0]  %s21_s8, 256, %s23_s12, [#allocation3], %s560_s13, %s560_s13, %s561_s14  }
   0xa   :  { %s562_s17 = smov [#allocation7]   ;;  %s63_s20 = sshll.u32 %s640_s5, 4  ;;  %s64_s20 = int_to_ptr.hbm [resolvable:$true] %s63_s20 }
   0xb   :  { %s50_s0 = sshll.u32 %s562_s17, 4  ;;  %s563_s21 = smov [#allocation8]   ;;  %s51_s0 = int_to_ptr.vmem [resolvable:$true] %s50_s0 }
   0xc   :  { %56 = dma.hbm_to_vmem [thread:$0]  %s49_s16, 1024, %s51_s0, [#allocation6], %s557_s9, %s557_s9, %s558_s10  }
   0xd   :  { %s65_s22 = sshll.u32 %s563_s21, 4  ;;  %s66_s22 = int_to_ptr.vmem [resolvable:$true] %s65_s22 }
   0xe   :  { %71 = dma.hbm_to_vmem [thread:$0]  %s64_s20, 1024, %s66_s22, [#allocation9], %s557_s9, %s557_s9, %s558_s10  }
   0xf   :  { %548 = dma.done.wait [#allocation3], 256  }
  0x10   :  { %549 = vsyncadd [#allocation3], 4294967040 }
  0x11   :  { %550 = dma.done.wait [#allocation6], 1280  }
  0x12   :  { %551 = vsyncadd [#allocation6], 4294966016 }
  0x13   :  { %552 = dma.done.wait [#allocation9], 1024  }
  0x14   :  { %553 = vsyncadd [#allocation9], 4294966272  ;;  %v399_v0 = vld [vmem:[#allocation5 + $0x8] sm:$0xff]  ;;  %v398_v1 = vld [vmem:[#allocation5] sm:$0xff]  ;;  %vm114_vm0 = vcmask 261120   ;;  %s564_s26 = smov [#allocation10]  }
  0x15   :  { %v407_v2 = vld [vmem:[#allocation7 + $0x38] sm:$0xff]  ;;  %124 = vmatpush.bf16.msra.mxu0 %v399_v0  ;;  %v91_v3 = vld [vmem:[#allocation2] sm:$0xff]  ;;  %v92_v4 = vld [vmem:[#allocation2 + $0x8] sm:$0xff]  ;;  %s308_s27 = sshll.u32 %s564_s26, 4  ;;  %s309_s27 = int_to_ptr.vmem [resolvable:$true] %s308_s27 }
  0x16   :  { %203 = vmatpush.bf16.msra.mxu1 %v407_v2  ;;  %v406_v5 = vld [vmem:[#allocation7 + $0x30] sm:$0xff]  ;;  %v93_v6 = vpack.c.bf16 %v92_v4, %v91_v3  ;;  %v405_v7 = vld [vmem:[#allocation7 + $0x28] sm:$0xff]  ;;  %v404_v8 = vld [vmem:[#allocation7 + $0x20] sm:$0xff] }
  0x17   :  { %v403_v9 = vld [vmem:[#allocation7 + $0x18] sm:$0xff]  ;;  %v402_v10 = vld [vmem:[#allocation7 + $0x10] sm:$0xff]  ;;  %v401_v11 = vld [vmem:[#allocation7 + $0x8] sm:$0xff] }
  0x18   :  { %v400_v12 = vld [vmem:[#allocation7] sm:$0xff]  ;;  %v415_v13 = vld [vmem:[#allocation8 + $0x38] sm:$0xff]  ;;  %v414_v14 = vld [vmem:[#allocation8 + $0x30] sm:$0xff] }
  0x19   :  { %125 = vmatpush.bf16.msra.mxu0 %v398_v1  ;;  %288 = vmatpush.bf16.msra.mxu2 %v415_v13  ;;  %v413_v15 = vld [vmem:[#allocation8 + $0x28] sm:$0xff]  ;;  %v412_v16 = vld [vmem:[#allocation8 + $0x20] sm:$0xff]  ;;  %v411_v25 = vld [vmem:[#allocation8 + $0x18] sm:$0xff] }
  0x1a   :  { %204 = vmatpush.bf16.msra.mxu1 %v406_v5  ;;  %v425_v18 = vld [vmem:[%s637_s2] ss:$0 sm:$0xff]  ;;  %v410_v26 = vld [vmem:[#allocation8 + $0x10] sm:$0xff]  ;;  %v409_v27 = vld [vmem:[#allocation8 + $0x8] sm:$0xff] }
  0x1b   :  { %v408_v28 = vld [vmem:[#allocation8] sm:$0xff] }
  0x1c   :  { %333 = vmatmul.msk.bf16.vlgmr.msra.gmra.mxu0 %vm114_vm0, %v93_v6  ;;  %v426_v30 = vld [vmem:[%s639_s4] ss:$0 sm:$0xff]  ;;  %s310_s4 = sshll.u32 %s642_s7, 4  ;;  %s311_s4 = int_to_ptr.hbm [resolvable:$true] %s310_s4 }
  0x1d   :  { %289 = vmatpush.bf16.msra.mxu2 %v414_v14  ;;  %v427_v37 = vld [vmem:[%s641_s6] ss:$0 sm:$0xff] }
  0x1e   :  { %205 = vmatpush.bf16.msra.mxu1 %v405_v7 }
  0x21   :  { %290 = vmatpush.bf16.msra.mxu2 %v413_v15 }
  0x22   :  { %206 = vmatpush.bf16.msra.mxu1 %v404_v8 }
  0x25   :  { %291 = vmatpush.bf16.msra.mxu2 %v412_v16 }
  0x26   :  { %207 = vmatpush.bf16.msra.mxu1 %v403_v9 }
  0x29   :  { %292 = vmatpush.bf16.msra.mxu2 %v411_v25 }
  0x2a   :  { %208 = vmatpush.bf16.msra.mxu1 %v402_v10 }
  0x2d   :  { %293 = vmatpush.bf16.msra.mxu2 %v410_v26 }
  0x2e   :  { %209 = vmatpush.bf16.msra.mxu1 %v401_v11 }
  0x31   :  { %294 = vmatpush.bf16.msra.mxu2 %v409_v27 }
  0x32   :  { %210 = vmatpush.bf16.msra.mxu1 %v400_v12 }
  0x35   :  { %295 = vmatpush.bf16.msra.mxu2 %v408_v28 }
  0x99   :  { %v127_v17 = vpop.f32.mrf.mxu0 }
  0x9a   :  { %v128_v19 = vadd.f32 %v425_v18, %v127_v17 }
  0x9c   :  { %v132_v22 = vmax.f32 %v128_v19, 0.0 }
  0xa1   :  { %v129_v20 = vpop.f32.mrf.mxu0 }
  0xa2   :  { %v130_v21 = vadd.f32 %v425_v18, %v129_v20 }
  0xa4   :  { %v133_v23 = vmax.f32 %v130_v21, 0.0 }
  0xa6   :  { %v134_v24 = vpack.c.bf16 %v133_v23, %v132_v22 }
  0xa8   :  { %211 = vmatmul.bf16.vlgmr.msra.gmra.mxu1 %v134_v24 }
 0x125   :  { %v212_v29 = vpop.f32.mrf.mxu1 }
 0x126   :  { %v213_v31 = vadd.f32 %v426_v30, %v212_v29 }
 0x128   :  { %v217_v34 = vmax.f32 %v213_v31, 0.0 }
 0x12d   :  { %v214_v32 = vpop.f32.mrf.mxu1 }
 0x12e   :  { %v215_v33 = vadd.f32 %v426_v30, %v214_v32 }
 0x130   :  { %v218_v35 = vmax.f32 %v215_v33, 0.0 }
 0x132   :  { %v219_v36 = vpack.c.bf16 %v218_v35, %v217_v34 }
 0x134   :  { %296 = vmatmul.bf16.vlgmr.msra.gmra.mxu2 %v219_v36 }
 0x1b7   :  { %v297_v38 = vpop.f32.mrf.mxu2 }
 0x1b8   :  { %v298_v39 = vadd.f32 %v427_v37, %v297_v38 }
 0x1ba   :  { %302 = vst [vmem:[#allocation10] sm:$0xff] %v298_v39 }
 0x1bf   :  { %v299_v40 = vpop.f32.mrf.mxu2 }
 0x1c0   :  { %v300_v41 = vadd.f32 %v427_v37, %v299_v40 }
 0x1c2   :  { %303 = vst [vmem:[#allocation10 + $0x8] sm:$0xff] %v300_v41 }
 0x1c3   :  { %316 = dma.vmem_to_hbm [thread:$0]  %s309_s27, 256, %s311_s4, [#allocation4], %s560_s13, %s560_s13, %s561_s14  }
 0x1c4   :  { %554 = dma.done.wait [#allocation4], 256  }
 0x1c5   :  { %555 = vsyncadd [#allocation4], 4294967040 }
 0x1c6   :  { %321 = vsyncpa [#allocation3], 1 }
 0x1c7   :  { %322 = vsyncpa [#allocation6], 1 }
 0x1c8   :  { %323 = vsyncpa [#allocation9], 1 }
 0x1c9   :  { %324 = vsyncpa [#allocation4], 1 }

</bundles_post_ra>
